<compile_context>
chip_gen: v6e
topology: v6e:2x2x1
jax: 0.10.0
libtpu: 0.0.40
codegen_flags: <defaults>
</compile_context>

<pallas_src>
import functools
import itertools

import numpy as np
import jax
import jax.numpy as jnp
from jax.experimental import pallas as pl
from jax.experimental.pallas import tpu as pltpu


# --------------------------- per-generation config ---------------------------
def _tpu_generation():
    """Best-effort TPU generation (5/6/7...); 0 if unknown."""
    try:
        kind = jax.devices()[0].device_kind.lower()
    except Exception:
        return 0
    for g in (7, 6, 5, 4):
        if f"v{g}" in kind:
            return g
    return 0


def _vmem_budget_bytes(gen):
    """Scoped-VMEM limit: half of physical, capped at 64 MiB (=> 32 MiB on v7x)."""
    phys = None
    try:
        phys = int(pltpu.get_tpu_info().vmem_capacity_bytes)
    except Exception:
        phys = None
    if not phys:
        phys = (64 << 20) if gen >= 7 else (128 << 20)
    return min(64 << 20, phys // 2)


def _cdiv(a, b):
    return -(-a // b)


def _round_up(x, m):
    return _cdiv(x, m) * m


def _pad_to(x, axis, size):
    pad = size - x.shape[axis]
    if pad <= 0:
        return x
    widths = [(0, 0)] * x.ndim
    widths[axis] = (0, pad)
    return jnp.pad(x, widths)


# ----------------------------- Pallas kernel --------------------------------
def _cost_kernel(logits_ref, onehot_t_ref, omask_ref, tmask_t_ref, tsum_ref,
                 c_ref, acc_ref, spsum_ref, sigsum_ref, *,
                 w_class, w_mask, w_dice, inv_p, tq, p_total, p_tile,
                 mask_points, compute_dtype):
    f32 = jnp.float32
    dims = (((1,), (0,)), ((), ()))          # 'nk,km->nm' (no in-kernel transposes)
    p = pl.program_id(2)

    @pl.when(p == 0)
    def _():
        acc_ref[...] = jnp.zeros_like(acc_ref)
        spsum_ref[...] = jnp.zeros_like(spsum_ref)
        sigsum_ref[...] = jnp.zeros_like(sigsum_ref)

    om_lo = omask_ref[0]                      # [TQ, PT]  bf16 (MXU operand)
    tm_lo = tmask_t_ref[0]                    # [PT, NTp] bf16 (MXU operand)
    om = om_lo.astype(compute_dtype)          # EUP/VPU sweep dtype (bf16 v6e/v7x, f32 v5e)

    # stable softplus; sigmoid derived from the same softplus: sig = exp(x - sp)
    sp = jnp.maximum(om, 0) + jnp.log1p(jnp.exp(-jnp.abs(om)))    # [TQ, PT]
    sig = jnp.exp(om - sp)                                        # [TQ, PT]

    if mask_points:
        # zero padded point columns: softplus(0)=ln2, sigmoid(0)=0.5 would
        # otherwise corrupt the row sums (matmuls are safe: padded t == 0)
        valid = (jax.lax.broadcasted_iota(jnp.int32, (1, p_tile), 1)
                 < (p_total - p * p_tile))
        sp = jnp.where(valid, sp, jnp.zeros_like(sp))
        sig = jnp.where(valid, sig, jnp.zeros_like(sig))

    # f32 row-sum accumulation across point tiles (XLU reduce)
    spsum_ref[...] += jnp.sum(sp.astype(f32), axis=-1, keepdims=True)
    sigsum_ref[...] += jnp.sum(sig.astype(f32), axis=-1, keepdims=True)

    # ONE fused MXU call for both mask matmuls (shared [PT,NTp] RHS, pushed once)
    lhs = jnp.concatenate([om_lo, sig.astype(om_lo.dtype)], axis=0)   # [2*TQ, PT]
    acc_ref[...] += jax.lax.dot_general(lhs, tm_lo, dims,
                                        preferred_element_type=f32)   # [2*TQ, NTp]

    @pl.when(p == pl.num_programs(2) - 1)
    def _():
        # ---- cost_class = -softmax(logits) @ onehot^T (f32, exact normalizer) --
        logits = logits_ref[0].astype(f32)                             # [TQ, C]
        m = jnp.max(logits, axis=-1, keepdims=True)
        e = jnp.exp(logits - m)
        prob = e / jnp.sum(e, axis=-1, keepdims=True)
        onehot_t = onehot_t_ref[0].astype(f32)                         # exact 0/1
        cost_class = -jax.lax.dot_general(prob, onehot_t, dims,
                                          preferred_element_type=f32)  # [TQ, NTp]

        om_dot_t = acc_ref[:tq, :]                                     # x @ t
        sig_dot_t = acc_ref[tq:, :]                                    # sigmoid(x) @ t

        # sigmoid CE, folded: softplus(-x) - softplus(x) = -x
        cost_mask_v = (spsum_ref[...] - om_dot_t) * inv_p

        # dice: denom >= 1, approx EUP reciprocal is within ~1e-3 rel (documented)
        denom = sigsum_ref[...] + tsum_ref[0] + 1.0
        cost_dice_v = 1.0 - (2.0 * sig_dot_t + 1.0) * pl.reciprocal(denom,
                                                                    approx=True)

        c_ref[0] = (w_mask * cost_mask_v + w_class * cost_class
                    + w_dice * cost_dice_v).astype(c_ref.dtype)


# ------------------------------- wrapper -------------------------------------
def compute_cost_matrices(logits, onehot, omask_pts, tmask_pts, *,
                          cost_class=1.0, cost_mask=1.0, cost_dice=1.0,
                          mask_dtype=jnp.bfloat16, compute_dtype=None,
                          p_tile_target=None, vmem_limit_bytes=None):
    """logits [B,NQ,C], onehot [B,NT,C], omask_pts [B,NQ,P], tmask_pts [B,NT,P]
    -> cost matrix [B,NQ,NT] (float32)."""
    B, NQ, C = logits.shape
    NT = onehot.shape[1]
    P = omask_pts.shape[-1]

    gen = _tpu_generation()
    if compute_dtype is None:
        # bf16 EUP/VPU sweeps on v6e/v7x; v5e has no bf16 VPU/EUP -> keep f32.
        compute_dtype = jnp.bfloat16 if gen >= 6 else jnp.float32
    if p_tile_target is None:
        # v7x has 64 MiB VMEM per TC -> smaller point tile; v5e/v6e have 128 MiB.
        p_tile_target = 8192 if gen in (5, 6) else 2048
    if vmem_limit_bytes is None:
        vmem_limit_bytes = _vmem_budget_bytes(gen)

    LANE = 128   # lane width (last-dim alignment)
    SUB = 16     # bf16 sublane packing (keeps the in-kernel concat tile-aligned)

    NTp = _round_up(NT, LANE)                 # lane-dense output / RHS columns

    # Query tiling: sublane-pack aligned; on v7x ensure >=2 parallel grid tiles
    # so both TensorCores get work.
    TQ = _round_up(NQ, SUB) if NQ <= 128 else 128
    NQp = _round_up(NQ, TQ)
    if gen >= 7:
        while B * (NQp // TQ) < 2 and TQ > SUB:
            TQ = max(SUB, _round_up(TQ // 2, SUB))
            NQp = _round_up(NQ, TQ)

    # Point (contraction) tiling: lane-aligned tile sized for the VMEM budget,
    # number of tiles chosen to minimize padding waste.
    Pp0 = _round_up(P, LANE)
    n_p = max(1, _cdiv(Pp0, p_tile_target))
    PT = _round_up(_cdiv(Pp0, n_p), LANE)
    Pp = n_p * PT

    f32 = jnp.float32
    # Pre-transpose RHS operands so the kernel contracts over the leading dim
    # (no in-kernel XLU transposes); mask/onehot operands stored bf16 (0/1 exact).
    logits_p = _pad_to(logits.astype(f32), 1, NQp)                                # [B,NQp,C]
    onehot_t = _pad_to(jnp.swapaxes(onehot, 1, 2).astype(mask_dtype), 2, NTp)     # [B,C,NTp]
    omask_p = _pad_to(_pad_to(omask_pts.astype(mask_dtype), 1, NQp), 2, Pp)       # [B,NQp,Pp]
    tmask_t = _pad_to(_pad_to(jnp.swapaxes(tmask_pts, 1, 2).astype(mask_dtype),
                              1, Pp), 2, NTp)                                     # [B,Pp,NTp]
    # target column sums hoisted out of the kernel (exact, f32, unpadded P)
    tsum = _pad_to(jnp.sum(tmask_pts.astype(f32), axis=-1), 1, NTp)[:, None, :]   # [B,1,NTp]

    kernel = functools.partial(
        _cost_kernel,
        w_class=float(cost_class), w_mask=float(cost_mask), w_dice=float(cost_dice),
        inv_p=1.0 / float(P), tq=TQ, p_total=P, p_tile=PT,
        mask_points=(Pp != P), compute_dtype=compute_dtype)

    out = pl.pallas_call(
        kernel,
        out_shape=jax.ShapeDtypeStruct((B, NQp, NTp), f32),
        grid_spec=pltpu.PrefetchScalarGridSpec(
            num_scalar_prefetch=0,
            grid=(B, NQp // TQ, n_p),
            in_specs=[
                pl.BlockSpec((1, TQ, C), lambda b, q, p: (b, q, 0)),
                pl.BlockSpec((1, C, NTp), lambda b, q, p: (b, 0, 0)),
                # TODO(synk): sweep pipeline_mode=pl.Buffered(3) on the two mask
                # operands if profiling shows exposed DMA at production P.
                pl.BlockSpec((1, TQ, PT), lambda b, q, p: (b, q, p)),
                pl.BlockSpec((1, PT, NTp), lambda b, q, p: (b, 0, p)),
                pl.BlockSpec((1, 1, NTp), lambda b, q, p: (b, 0, 0)),
            ],
            out_specs=pl.BlockSpec((1, TQ, NTp), lambda b, q, p: (b, q, 0)),
            scratch_shapes=[
                pltpu.VMEM((2 * TQ, NTp), f32),   # fused [x; sigmoid(x)] @ t acc
                pltpu.VMEM((TQ, 1), f32),         # softplus row-sum acc
                pltpu.VMEM((TQ, 1), f32),         # sigmoid  row-sum acc
            ]),
        compiler_params=pltpu.CompilerParams(
            dimension_semantics=("parallel", "parallel", "arbitrary"),
            vmem_limit_bytes=vmem_limit_bytes),
    )(logits_p, onehot_t, omask_p, tmask_t, tsum)

    # Slice off NQ/NT padding (padded target columns carry nonzero cost_mask and
    # must never reach the assignment step — keep this invariant).
    return out[:, :NQ, :NT]


# ------------------------------ JAX glue -------------------------------------
def point_sample(masks, coords):
    """Bilinear point sampling == detectron2 point_sample /
    F.grid_sample(..., align_corners=False, padding_mode='zeros').

    masks:  [N, H, W] float,  coords: [P, 2] in [0,1], last dim = (x, y) -> [N, P]
    """
    N, H, W = masks.shape
    g = 2.0 * coords - 1.0
    x = ((g[:, 0] + 1.0) * W - 1.0) / 2.0
    y = ((g[:, 1] + 1.0) * H - 1.0) / 2.0
    x0 = jnp.floor(x); x1 = x0 + 1.0
    y0 = jnp.floor(y); y1 = y0 + 1.0
    wx1 = x - x0; wx0 = 1.0 - wx1
    wy1 = y - y0; wy0 = 1.0 - wy1

    def gather(yy, xx):
        valid = (xx >= 0) & (xx <= W - 1) & (yy >= 0) & (yy <= H - 1)
        xi = jnp.clip(xx, 0, W - 1).astype(jnp.int32)
        yi = jnp.clip(yy, 0, H - 1).astype(jnp.int32)
        v = masks[:, yi, xi]
        return jnp.where(valid[None, :], v, 0.0)

    return (gather(y0, x0) * (wy0 * wx0)[None, :]
            + gather(y0, x1) * (wy0 * wx1)[None, :]
            + gather(y1, x0) * (wy1 * wx0)[None, :]
            + gather(y1, x1) * (wy1 * wx1)[None, :])


def _prepare_and_cost(pred_logits, pred_masks, labels, tgt_masks, pts, *,
                      cost_class, cost_mask, cost_dice):
    """Batched point sampling + one-hot + Pallas cost kernel."""
    C = pred_logits.shape[-1]
    omask_pts = jax.vmap(point_sample)(pred_masks.astype(jnp.float32), pts)   # [B,NQ,P]
    tmask_pts = jax.vmap(point_sample)(tgt_masks.astype(jnp.float32), pts)    # [B,NT,P]
    onehot = jax.nn.one_hot(labels, C, dtype=jnp.float32)                     # [B,NT,C]
    return compute_cost_matrices(
        pred_logits.astype(jnp.float32), onehot, omask_pts, tmask_pts,
        cost_class=cost_class, cost_mask=cost_mask, cost_dice=cost_dice)


def linear_sum_assignment_small(C):
    """Brute-force Hungarian assignment for tiny cost matrices (host side)."""
    # TODO(synk): scipy.optimize.linear_sum_assignment has no Pallas equivalent;
    # this exhaustive search matches it exactly for the small demo shapes.
    C = np.asarray(C)
    nq, nt = C.shape
    best_cost, best_perm = None, None
    for perm in itertools.permutations(range(nq), nt):
        cost = sum(C[perm[j], j] for j in range(nt))
        if best_cost is None or cost < best_cost:
            best_cost, best_perm = cost, perm
    rows = np.asarray(best_perm, dtype=np.int64)
    cols = np.arange(nt, dtype=np.int64)
    order = np.argsort(rows)
    return rows[order], cols[order]


class HungarianMatcher:
    def __init__(self, cost_class=1.0, cost_mask=1.0, cost_dice=1.0, num_points=32):
        assert cost_class != 0 or cost_mask != 0 or cost_dice != 0
        self.cost_class = cost_class
        self.cost_mask = cost_mask
        self.cost_dice = cost_dice
        self.num_points = num_points
        self._cost_fn = jax.jit(functools.partial(
            _prepare_and_cost, cost_class=float(cost_class),
            cost_mask=float(cost_mask), cost_dice=float(cost_dice)))

    def __call__(self, outputs, targets, rng):
        pred_logits = outputs["pred_logits"]            # [B, NQ, C]
        pred_masks = outputs["pred_masks"]              # [B, NQ, H, W]
        B = pred_logits.shape[0]

        labels = jnp.stack([t["labels"] for t in targets])                        # [B, NT]
        tgt_masks = jnp.stack([t["masks"] for t in targets]).astype(jnp.float32)  # [B,NT,H,W]

        # independent random points per batch element (== torch.rand in the loop)
        _, kpts = jax.random.split(rng)
        pts = jax.random.uniform(kpts, (B, self.num_points, 2))                   # [B, P, 2]

        Cmat = self._cost_fn(pred_logits, pred_masks, labels, tgt_masks, pts)
        Cmat = jax.block_until_ready(Cmat)

        Cnp = np.asarray(Cmat)
        indices = [linear_sum_assignment_small(Cnp[b]) for b in range(B)]
        return indices, Cmat


# ----------------------- pure-JAX reference (for checking) -------------------
def _reference_cost(pred_logits, pred_masks, labels, tgt_masks, pts,
                    w_class, w_mask, w_dice):
    C = pred_logits.shape[-1]
    om = jax.vmap(point_sample)(pred_masks.astype(jnp.float32), pts)
    tm = jax.vmap(point_sample)(tgt_masks.astype(jnp.float32), pts)
    onehot = jax.nn.one_hot(labels, C, dtype=jnp.float32)
    P = om.shape[-1]
    prob = jax.nn.softmax(pred_logits.astype(jnp.float32), axis=-1)
    cost_class = -jnp.einsum('bnc,bmc->bnm', prob, onehot)
    pos = jax.nn.softplus(-om)
    neg = jax.nn.softplus(om)
    cost_mask = (jnp.einsum('bnp,bmp->bnm', pos, tm)
                 + jnp.einsum('bnp,bmp->bnm', neg, 1.0 - tm)) / P
    sig = jax.nn.sigmoid(om)
    numer = 2.0 * jnp.einsum('bnp,bmp->bnm', sig, tm)
    denom = sig.sum(-1)[:, :, None] + tm.sum(-1)[:, None, :]
    cost_dice = 1.0 - (numer + 1.0) / (denom + 1.0)
    return w_mask * cost_mask + w_class * cost_class + w_dice * cost_dice


# ------------------------------- demo ----------------------------------------
if __name__ == "__main__":
    key = jax.random.PRNGKey(0)
    B, NQ, NUM_CLASSES, NT, H, W, P = 2, 8, 16, 4, 16, 16, 32

    k1, k2, k3, k4, kpts = jax.random.split(key, 5)
    pred_logits = jax.random.normal(k1, (B, NQ, NUM_CLASSES), jnp.float32)
    pred_masks = jax.random.normal(k2, (B, NQ, H, W), jnp.float32)
    labels = jax.random.randint(k3, (B, NT), 0, NUM_CLASSES)
    tgt_masks = (jax.random.uniform(k4, (B, NT, H, W)) > 0.5).astype(jnp.float32)

    outputs = {"pred_logits": pred_logits, "pred_masks": pred_masks}
    targets = [{"labels": labels[b], "masks": tgt_masks[b]} for b in range(B)]

    matcher = HungarianMatcher(cost_class=1.0, cost_mask=1.0, cost_dice=1.0,
                               num_points=P)
    indices, Cmat = matcher(outputs, targets, kpts)
    Cmat = jax.block_until_ready(Cmat)

    # sanity checks
    assert Cmat.shape == (B, NQ, NT)
    Cnp = np.asarray(Cmat)
    assert np.all(np.isfinite(Cnp))

    # numerical check vs. a pure-JAX f32 reference. bf16 matmul operands (and, on
    # v6e/v7x, bf16 transcendental sweeps) -> loose tolerance by design; this is
    # a matching cost, near-degenerate ties may still flip under ~1e-2 noise.
    _, kpts_used = jax.random.split(kpts)          # reproduce the matcher's points
    pts_used = jax.random.uniform(kpts_used, (B, P, 2))
    Cref = np.asarray(_reference_cost(pred_logits, pred_masks, labels, tgt_masks,
                                      pts_used, 1.0, 1.0, 1.0))
    assert np.allclose(Cnp, Cref, atol=5e-2, rtol=5e-2), \
        f"max abs diff {np.max(np.abs(Cnp - Cref))}"

    for i, j in indices:
        assert i.shape == (NT,) and j.shape == (NT,)

    print("KERNEL_OK")
</pallas_src>

<mosaic_0001>
module attributes {stable_mosaic.version = 11 : i64} {
  func.func @_cost_kernel(%arg0: i32, %arg1: i32, %arg2: i32, %arg3: memref<1x16x16xf32, #tpu.memory_space<vmem>>, %arg4: memref<1x16x128xbf16, #tpu.memory_space<vmem>>, %arg5: memref<1x16x128xbf16, #tpu.memory_space<vmem>>, %arg6: memref<1x128x128xbf16, #tpu.memory_space<vmem>>, %arg7: memref<1x1x128xf32, #tpu.memory_space<vmem>>, %arg8: memref<1x16x128xf32, #tpu.memory_space<vmem>>, %arg9: memref<32x128xf32, #tpu.memory_space<vmem>>, %arg10: memref<16x1xf32, #tpu.memory_space<vmem>>, %arg11: memref<16x1xf32, #tpu.memory_space<vmem>>) attributes {dimension_semantics = [#tpu.dimension_semantics<parallel>, #tpu.dimension_semantics<parallel>, #tpu.dimension_semantics<arbitrary>], iteration_bounds = array<i64: 2, 1, 1>, scalar_prefetch = 0 : i64, scratch_operands = 3 : i64, tpu.core_type = #tpu.core_type<tc>, window_params = [{transform_indices = @transform_0, window_bounds = array<i64: 1, 16, 16>}, {transform_indices = @transform_1, window_bounds = array<i64: 1, 16, 128>}, {transform_indices = @transform_2, window_bounds = array<i64: 1, 16, 128>}, {transform_indices = @transform_3, window_bounds = array<i64: 1, 128, 128>}, {transform_indices = @transform_4, window_bounds = array<i64: 1, 1, 128>}, {transform_indices = @transform_5, window_bounds = array<i64: 1, 16, 128>}]} {
    %c0_i32 = arith.constant 0 : i32
    %0 = arith.cmpi eq, %arg2, %c0_i32 : i32
    %1 = arith.extui %0 : i1 to i32
    %c0_i32_0 = arith.constant 0 : i32
    %2 = arith.cmpi ne, %1, %c0_i32_0 : i32
    scf.if %2 {
      %cst_26 = arith.constant 0.000000e+00 : f32
      %50 = vector.broadcast %cst_26 : f32 to vector<32x128xf32>
      %c0_27 = arith.constant 0 : index
      %c0_28 = arith.constant 0 : index
      %51 = vector.load %arg9[%c0_27, %c0_28] : memref<32x128xf32, #tpu.memory_space<vmem>>, vector<32x128xf32>
      tpu.vector_store %arg9[%c0_27, %c0_28], %50 {strides = array<i32>} : memref<32x128xf32, #tpu.memory_space<vmem>>, vector<32x128xf32>,
      %cst_29 = arith.constant 0.000000e+00 : f32
      %52 = vector.broadcast %cst_29 : f32 to vector<16x1xf32>
      %c0_30 = arith.constant 0 : index
      %c0_31 = arith.constant 0 : index
      %53 = vector.load %arg10[%c0_30, %c0_31] : memref<16x1xf32, #tpu.memory_space<vmem>>, vector<16x1xf32>
      tpu.vector_store %arg10[%c0_30, %c0_31], %52 {strides = array<i32>} : memref<16x1xf32, #tpu.memory_space<vmem>>, vector<16x1xf32>,
      %cst_32 = arith.constant 0.000000e+00 : f32
      %54 = vector.broadcast %cst_32 : f32 to vector<16x1xf32>
      %c0_33 = arith.constant 0 : index
      %c0_34 = arith.constant 0 : index
      %55 = vector.load %arg11[%c0_33, %c0_34] : memref<16x1xf32, #tpu.memory_space<vmem>>, vector<16x1xf32>
      tpu.vector_store %arg11[%c0_33, %c0_34], %54 {strides = array<i32>} : memref<16x1xf32, #tpu.memory_space<vmem>>, vector<16x1xf32>,
    } else {
    }
    %c0 = arith.constant 0 : index
    %c0_1 = arith.constant 0 : index
    %c0_2 = arith.constant 0 : index
    %3 = vector.load %arg5[%c0, %c0_1, %c0_2] : memref<1x16x128xbf16, #tpu.memory_space<vmem>>, vector<1x16x128xbf16>
    %4 = vector.shape_cast %3 : vector<1x16x128xbf16> to vector<16x128xbf16>
    %c0_3 = arith.constant 0 : index
    %c0_4 = arith.constant 0 : index
    %c0_5 = arith.constant 0 : index
    %5 = vector.load %arg6[%c0_3, %c0_4, %c0_5] : memref<1x128x128xbf16, #tpu.memory_space<vmem>>, vector<1x128x128xbf16>
    %6 = vector.shape_cast %5 : vector<1x128x128xbf16> to vector<128x128xbf16>
    %7 = arith.extf %4 : vector<16x128xbf16> to vector<16x128xf32>
    %cst = arith.constant 0.000000e+00 : f32
    %8 = vector.broadcast %cst : f32 to vector<16x128xf32>
    %9 = arith.maximumf %7, %8 : vector<16x128xf32>
    %10 = math.absf %7 : vector<16x128xf32>
    %cst_6 = arith.constant 0.000000e+00 : f32
    %11 = vector.broadcast %cst_6 : f32 to vector<16x128xf32>
    %12 = arith.subf %11, %10 : vector<16x128xf32>
    %13 = math.exp %12 : vector<16x128xf32>
    %14 = math.log1p %13 : vector<16x128xf32>
    %15 = arith.addf %9, %14 : vector<16x128xf32>
    %16 = arith.subf %7, %15 : vector<16x128xf32>
    %17 = math.exp %16 : vector<16x128xf32>
    %18 = tpu.iota {dimensions = array<i32: 1>} : vector<1x128xi32>
    %c128_i32 = arith.constant 128 : i32
    %19 = arith.muli %arg2, %c128_i32 : i32
    %c32_i32 = arith.constant 32 : i32
    %20 = arith.subi %c32_i32, %19 : i32
    %21 = vector.broadcast %20 : i32 to vector<1x128xi32>
    %22 = arith.cmpi slt, %18, %21 : vector<1x128xi32>
    %cst_7 = arith.constant 0.000000e+00 : f32
    %23 = vector.broadcast %cst_7 : f32 to vector<16x128xf32>
    %24 = vector.shape_cast %22 : vector<1x128xi1> to vector<1x128xi1>
    %25 = vector.broadcast %24 : vector<1x128xi1> to vector<16x128xi1>
    %26 = arith.select %25, %15, %23 : vector<16x128xi1>, vector<16x128xf32>
    %cst_8 = arith.constant 0.000000e+00 : f32
    %27 = vector.broadcast %cst_8 : f32 to vector<16x128xf32>
    %28 = vector.shape_cast %22 : vector<1x128xi1> to vector<1x128xi1>
    %29 = vector.broadcast %28 : vector<1x128xi1> to vector<16x128xi1>
    %30 = arith.select %29, %17, %27 : vector<16x128xi1>, vector<16x128xf32>
    %c0_9 = arith.constant 0 : index
    %c0_10 = arith.constant 0 : index
    %31 = vector.load %arg10[%c0_9, %c0_10] : memref<16x1xf32, #tpu.memory_space<vmem>>, vector<16x1xf32>
    %cst_11 = arith.constant dense<0.000000e+00> : vector<16xf32>
    %32 = vector.multi_reduction <add>, %26, %cst_11 [1] : vector<16x128xf32> to vector<16xf32>
    %33 = vector.shape_cast %32 : vector<16xf32> to vector<16x1xf32>
    %34 = arith.addf %31, %33 : vector<16x1xf32>
    %c0_12 = arith.constant 0 : index
    %c0_13 = arith.constant 0 : index
    %35 = vector.load %arg10[%c0_12, %c0_13] : memref<16x1xf32, #tpu.memory_space<vmem>>, vector<16x1xf32>
    tpu.vector_store %arg10[%c0_12, %c0_13], %34 {strides = array<i32>} : memref<16x1xf32, #tpu.memory_space<vmem>>, vector<16x1xf32>,
    %c0_14 = arith.constant 0 : index
    %c0_15 = arith.constant 0 : index
    %36 = vector.load %arg11[%c0_14, %c0_15] : memref<16x1xf32, #tpu.memory_space<vmem>>, vector<16x1xf32>
    %cst_16 = arith.constant dense<0.000000e+00> : vector<16xf32>
    %37 = vector.multi_reduction <add>, %30, %cst_16 [1] : vector<16x128xf32> to vector<16xf32>
    %38 = vector.shape_cast %37 : vector<16xf32> to vector<16x1xf32>
    %39 = arith.addf %36, %38 : vector<16x1xf32>
    %c0_17 = arith.constant 0 : index
    %c0_18 = arith.constant 0 : index
    %40 = vector.load %arg11[%c0_17, %c0_18] : memref<16x1xf32, #tpu.memory_space<vmem>>, vector<16x1xf32>
    tpu.vector_store %arg11[%c0_17, %c0_18], %39 {strides = array<i32>} : memref<16x1xf32, #tpu.memory_space<vmem>>, vector<16x1xf32>,
    %41 = arith.truncf %30 : vector<16x128xf32> to vector<16x128xbf16>
    %42 = tpu.concatenate %4, %41 in 0 : vector<16x128xbf16>, vector<16x128xbf16> -> vector<32x128xbf16>
    %c0_19 = arith.constant 0 : index
    %c0_20 = arith.constant 0 : index
    %43 = vector.load %arg9[%c0_19, %c0_20] : memref<32x128xf32, #tpu.memory_space<vmem>>, vector<32x128xf32>
    %cst_21 = arith.constant dense<0.000000e+00> : vector<32x128xf32>
    %44 = tpu.matmul %42, %6, %cst_21 {dimension_numbers = #tpu.dot_dimension_numbers<[1], [0], [0], [1], [0, 0, 1, 1], [], []>} : vector<32x128xbf16>, vector<128x128xbf16>, vector<32x128xf32> -> vector<32x128xf32>
    %45 = arith.addf %43, %44 : vector<32x128xf32>
    %c0_22 = arith.constant 0 : index
    %c0_23 = arith.constant 0 : index
    %46 = vector.load %arg9[%c0_22, %c0_23] : memref<32x128xf32, #tpu.memory_space<vmem>>, vector<32x128xf32>
    tpu.vector_store %arg9[%c0_22, %c0_23], %45 {strides = array<i32>} : memref<32x128xf32, #tpu.memory_space<vmem>>, vector<32x128xf32>,
    %c0_i32_24 = arith.constant 0 : i32
    %47 = arith.cmpi eq, %arg2, %c0_i32_24 : i32
    %48 = arith.extui %47 : i1 to i32
    %c0_i32_25 = arith.constant 0 : i32
    %49 = arith.cmpi ne, %48, %c0_i32_25 : i32
    scf.if %49 {
      %c0_26 = arith.constant 0 : index
      %c0_27 = arith.constant 0 : index
      %c0_28 = arith.constant 0 : index
      %50 = vector.load %arg3[%c0_26, %c0_27, %c0_28] : memref<1x16x16xf32, #tpu.memory_space<vmem>>, vector<1x16x16xf32>
      %51 = vector.shape_cast %50 : vector<1x16x16xf32> to vector<16x16xf32>
      %cst_29 = arith.constant dense<0xFF800000> : vector<16xf32>
      %52 = vector.multi_reduction <maximumf>, %51, %cst_29 [1] : vector<16x16xf32> to vector<16xf32>
      %53 = vector.shape_cast %52 : vector<16xf32> to vector<16x1xf32>
      %54 = vector.broadcast %53 : vector<16x1xf32> to vector<16x16xf32>
      %55 = arith.subf %51, %54 : vector<16x16xf32>
      %56 = math.exp %55 : vector<16x16xf32>
      %cst_30 = arith.constant dense<0.000000e+00> : vector<16xf32>
      %57 = vector.multi_reduction <add>, %56, %cst_30 [1] : vector<16x16xf32> to vector<16xf32>
      %58 = vector.shape_cast %57 : vector<16xf32> to vector<16x1xf32>
      %59 = vector.broadcast %58 : vector<16x1xf32> to vector<16x16xf32>
      %60 = arith.divf %56, %59 : vector<16x16xf32>
      %c0_31 = arith.constant 0 : index
      %c0_32 = arith.constant 0 : index
      %c0_33 = arith.constant 0 : index
      %61 = vector.load %arg4[%c0_31, %c0_32, %c0_33] : memref<1x16x128xbf16, #tpu.memory_space<vmem>>, vector<1x16x128xbf16>
      %62 = vector.shape_cast %61 : vector<1x16x128xbf16> to vector<16x128xbf16>
      %63 = arith.extf %62 : vector<16x128xbf16> to vector<16x128xf32>
      %cst_34 = arith.constant dense<0.000000e+00> : vector<16x128xf32>
      %64 = tpu.matmul %60, %63, %cst_34 {dimension_numbers = #tpu.dot_dimension_numbers<[1], [0], [0], [1], [0, 0, 1, 1], [], []>} : vector<16x16xf32>, vector<16x128xf32>, vector<16x128xf32> -> vector<16x128xf32>
      %cst_35 = arith.constant 0.000000e+00 : f32
      %65 = vector.broadcast %cst_35 : f32 to vector<16x128xf32>
      %66 = arith.subf %65, %64 : vector<16x128xf32>
      %c0_36 = arith.constant 0 : index
      %c0_37 = arith.constant 0 : index
      %67 = vector.load %arg9[%c0_36, %c0_37] : memref<32x128xf32, #tpu.memory_space<vmem>>, vector<16x128xf32>
      %c16 = arith.constant 16 : index
      %c0_38 = arith.constant 0 : index
      %68 = vector.load %arg9[%c16, %c0_38] : memref<32x128xf32, #tpu.memory_space<vmem>>, vector<16x128xf32>
      %c0_39 = arith.constant 0 : index
      %c0_40 = arith.constant 0 : index
      %69 = vector.load %arg10[%c0_39, %c0_40] : memref<16x1xf32, #tpu.memory_space<vmem>>, vector<16x1xf32>
      %70 = vector.broadcast %69 : vector<16x1xf32> to vector<16x128xf32>
      %71 = arith.subf %70, %67 : vector<16x128xf32>
      %cst_41 = arith.constant 3.125000e-02 : f32
      %72 = vector.broadcast %cst_41 : f32 to vector<16x128xf32>
      %73 = arith.mulf %71, %72 : vector<16x128xf32>
      %c0_42 = arith.constant 0 : index
      %c0_43 = arith.constant 0 : index
      %74 = vector.load %arg11[%c0_42, %c0_43] : memref<16x1xf32, #tpu.memory_space<vmem>>, vector<16x1xf32>
      %c0_44 = arith.constant 0 : index
      %c0_45 = arith.constant 0 : index
      %c0_46 = arith.constant 0 : index
      %75 = vector.load %arg7[%c0_44, %c0_45, %c0_46] : memref<1x1x128xf32, #tpu.memory_space<vmem>>, vector<1x1x128xf32>
      %76 = vector.shape_cast %75 : vector<1x1x128xf32> to vector<1x128xf32>
      %77 = vector.broadcast %74 : vector<16x1xf32> to vector<16x128xf32>
      %78 = vector.broadcast %76 : vector<1x128xf32> to vector<16x128xf32>
      %79 = arith.addf %77, %78 : vector<16x128xf32>
      %cst_47 = arith.constant 1.000000e+00 : f32
      %80 = vector.broadcast %cst_47 : f32 to vector<16x128xf32>
      %81 = arith.addf %79, %80 : vector<16x128xf32>
      %cst_48 = arith.constant 2.000000e+00 : f32
      %82 = vector.broadcast %cst_48 : f32 to vector<16x128xf32>
      %83 = arith.mulf %82, %68 : vector<16x128xf32>
      %cst_49 = arith.constant 1.000000e+00 : f32
      %84 = vector.broadcast %cst_49 : f32 to vector<16x128xf32>
      %85 = arith.addf %83, %84 : vector<16x128xf32>
      %86 = tpu.reciprocal %81 {approx = true} : vector<16x128xf32> -> vector<16x128xf32>
      %87 = arith.mulf %85, %86 : vector<16x128xf32>
      %cst_50 = arith.constant 1.000000e+00 : f32
      %88 = vector.broadcast %cst_50 : f32 to vector<16x128xf32>
      %89 = arith.subf %88, %87 : vector<16x128xf32>
      %cst_51 = arith.constant 1.000000e+00 : f32
      %90 = vector.broadcast %cst_51 : f32 to vector<16x128xf32>
      %91 = arith.mulf %90, %73 : vector<16x128xf32>
      %cst_52 = arith.constant 1.000000e+00 : f32
      %92 = vector.broadcast %cst_52 : f32 to vector<16x128xf32>
      %93 = arith.mulf %92, %66 : vector<16x128xf32>
      %94 = arith.addf %91, %93 : vector<16x128xf32>
      %cst_53 = arith.constant 1.000000e+00 : f32
      %95 = vector.broadcast %cst_53 : f32 to vector<16x128xf32>
      %96 = arith.mulf %95, %89 : vector<16x128xf32>
      %97 = arith.addf %94, %96 : vector<16x128xf32>
      %c0_54 = arith.constant 0 : index
      %c0_55 = arith.constant 0 : index
      %c0_56 = arith.constant 0 : index
      %98 = vector.load %arg8[%c0_54, %c0_55, %c0_56] : memref<1x16x128xf32, #tpu.memory_space<vmem>>, vector<1x16x128xf32>
      %99 = vector.shape_cast %98 : vector<1x16x128xf32> to vector<16x128xf32>
      %100 = vector.shape_cast %97 : vector<16x128xf32> to vector<1x16x128xf32>
      tpu.vector_store %arg8[%c0_54, %c0_55, %c0_56], %100 {strides = array<i32>} : memref<1x16x128xf32, #tpu.memory_space<vmem>>, vector<1x16x128xf32>,
    } else {
    }
    return
  }
  func.func @transform_0(%arg0: i32, %arg1: i32, %arg2: i32) -> (i32, i32, i32) {
    %c0_i32 = arith.constant 0 : i32
    %c0_i32_0 = arith.constant 0 : i32
    return %arg0, %arg1, %c0_i32 : i32, i32, i32
  }
  func.func @transform_1(%arg0: i32, %arg1: i32, %arg2: i32) -> (i32, i32, i32) {
    %c0_i32 = arith.constant 0 : i32
    %c0_i32_0 = arith.constant 0 : i32
    %c0_i32_1 = arith.constant 0 : i32
    return %arg0, %c0_i32, %c0_i32_0 : i32, i32, i32
  }
  func.func @transform_2(%arg0: i32, %arg1: i32, %arg2: i32) -> (i32, i32, i32) {
    %c0_i32 = arith.constant 0 : i32
    return %arg0, %arg1, %arg2 : i32, i32, i32
  }
  func.func @transform_3(%arg0: i32, %arg1: i32, %arg2: i32) -> (i32, i32, i32) {
    %c0_i32 = arith.constant 0 : i32
    %c0_i32_0 = arith.constant 0 : i32
    return %arg0, %c0_i32, %arg2 : i32, i32, i32
  }
  func.func @transform_4(%arg0: i32, %arg1: i32, %arg2: i32) -> (i32, i32, i32) {
    %c0_i32 = arith.constant 0 : i32
    %c0_i32_0 = arith.constant 0 : i32
    %c0_i32_1 = arith.constant 0 : i32
    return %arg0, %c0_i32, %c0_i32_0 : i32, i32, i32
  }
  func.func @transform_5(%arg0: i32, %arg1: i32, %arg2: i32) -> (i32, i32, i32) {
    %c0_i32 = arith.constant 0 : i32
    %c0_i32_0 = arith.constant 0 : i32
    return %arg0, %arg1, %c0_i32 : i32, i32, i32
  }
}

</mosaic_0001>

<bundles_post_ra>
// kernel: _prepare_and_cost.1
= control target key start
LH: loop header
LB: loop body
LE: loop exit
PB: predicated region body
PF: predicated region fallthrough
CT: control target
= control target key end

     0   :  { %s1126_s18 = smov 0   ;;  %s1128_s19 = smov 0   ;;  %s1233_s0 = inlined_call_operand.vmem [shape: f32[2,16,16], index: 0, kind: input, shape index: {}]   ;;  %s1234_s1 = inlined_call_operand.vmem [shape: bf16[2,16,128], index: 1, kind: input, shape index: {}]   ;;  %s1235_s2 = inlined_call_operand.vmem [shape: bf16[2,16,128], index: 2, kind: input, shape index: {}]   ;;  %s1236_s3 = inlined_call_operand.vmem [shape: bf16[2,128,128], index: 3, kind: input, shape index: {}]   ;;  %s1237_s4 = inlined_call_operand.vmem [shape: f32[2,1,128], index: 4, kind: input, shape index: {}]   ;;  %s1238_s5 = inlined_call_operand.vmem [shape: f32[2,16,128], index: 5, kind: output, shape index: {}]  }
   0x1   :  { %s1130_s20 = smov 0  }
   0x2 LB: > { %s34_s21 = sadd.s32 1, %s1088_s19  ;;  %p930_p0 = scmp.ge.s32.totalorder %s1092_s20, 1  ;;  %s1092_s20 = sphi %s1130_s20, %s15_s20   ;;  %s1088_s19 = sphi %s1128_s19, %s1240_s19   ;;  %s1084_s18 = sphi %s1126_s18, %s1239_s18  }
   0x3   : > { %p36_p1 = scmp.ge.s32.totalorder %s34_s21, 2  ;;  %p270_p2 = scmp.lt.s32.totalorder %s1092_s20, 3 }
   0x5   : > { %s1242_s21 = smov (%p36_p1, %s34_s21), 0  ;;  %p271_p3 = pnand %p930_p0, %p270_p2 }
   0x6   : > { %p335_p4 = scmp.lt.s32.totalorder (!%p271_p3), %s1084_s18, 1 }
   0x7   : > { %274 = sbr.rel (%p271_p3) target bundleno = 534 (0x216), region = 40 }
   0xc   : > { %s1244_s18 = smov (!%p335_p4, %s1084_s18), 1  ;;  %vm607_vm0 = vcmask 130048   ;;  %v453_v28 = vlaneseq  ;;  %vm392_vm5 = vcmask 7168  }
   0xd   : > { %s958_s22 = sshll.u32 %s1244_s18, 4  ;;  %s961_s26 = sshll.u32 %s1244_s18, 6 }
   0xe   : > { %s342_s25 = scalar_lea.vmem %s1233_s0, %s958_s22  ;;  %s1160_s29 = scalar_lea.vmem %s1236_s3, %s961_s26  ;;  %v454_v37 = vand.u32 127, %v453_v28 }
   0xf   : > { %v1153_v0 = vld [vmem:[%s342_s25] sm:$0xff]  ;;  %v1155_v1 = vld [vmem:[%s342_s25 + $0x8] sm:$0xff]  ;;  %s959_s30 = sshll.u32 %s1244_s18, 3  ;;  %v1036_v13 = vld [vmem:[%s1160_s29 + $0x38] sm:$0xff]   ;;  %s372_s14 = scalar_lea.vmem %s1237_s4, %s1244_s18 }
  0x10   : > { %v608_v2 = vsel %vm607_vm0, %v1153_v0, -inf  ;;  %v611_v3 = vsel %vm607_vm0, %v1155_v1, -inf  ;;  %s360_s8 = scalar_lea.vmem %s1235_s2, %s959_s30  ;;  %v1037_v14 = vld [vmem:[%s1160_s29 + $0x30] sm:$0xff]   ;;  %981 = vmatprep.subr.bf16.mxu0 %v1036_v13  ;;  %v1038_v19 = vld [vmem:[%s1160_s29 + $0x28] sm:$0xff]   ;;  %v1039_v20 = vld [vmem:[%s1160_s29 + $0x20] sm:$0xff]   ;;  %vm458_vm3 = vcmp.lt.s32.totalorder %v454_v37, 32  ;;  %s348_s11 = scalar_lea.vmem %s1234_s1, %s959_s30 }
  0x11   : > { %609 = vmax.xlane.f32.xlu0 %v608_v2  ;;  %v397_v4 = vld [vmem:[%s360_s8] sm:$0xff]   ;;  %982 = vmatpush3.bf16.msra.mxu0 %v1036_v13  ;;  %v1040_v23 = vld [vmem:[%s1160_s29 + $0x18] sm:$0xff]   ;;  %v1041_v29 = vld [vmem:[%s1160_s29 + $0x10] sm:$0xff]   ;;  %s381_s17 = scalar_lea.vmem %s1238_s5, %s958_s22 }
  0x12   : > { %v1172_v5 = vunpack.c.l.bf16 %v397_v4  ;;  %v1174_v6 = vunpack.c.h.bf16 %v397_v4  ;;  %997 = vmatprep.mubr.bf16.mxu0 %v397_v4  ;;  %983 = vmatprep.subr.bf16.mxu0 %v1037_v14  ;;  %v1042_v39 = vld [vmem:[%s1160_s29 + $0x8] sm:$0xff]   ;;  %v1043_v45 = vld [vmem:[%s1160_s29] sm:$0xff]   ;;  %vm950_vm4 = vmpackc.low %vm458_vm3, %vm458_vm3 }
  0x14   : > { %v419_v7 = vand.u32 2147483647, %v1172_v5  ;;  %v420_v8 = vand.u32 2147483647, %v1174_v6  ;;  %v417_v32 = vmax.f32 %v1172_v5, 0.0  ;;  %v418_v36 = vmax.f32 %v1174_v6, 0.0 }
  0x15   : > { %612 = vmax.xlane.f32.xlu0 %v611_v3  ;;  %984 = vmatpush3.bf16.msra.mxu0 %v1037_v14 }
  0x16   : > { %v421_v9 = vsub.f32 0.0, %v419_v7  ;;  %v422_v10 = vsub.f32 0.0, %v420_v8  ;;  %985 = vmatprep.subr.bf16.mxu0 %v1038_v19 }
  0x18   : > { %v423_v11 = vmul.f32 1.442695, %v421_v9  ;;  %v425_v12 = vmul.f32 1.442695, %v422_v10 }
  0x19   : > { %986 = vmatpush3.bf16.msra.mxu0 %v1038_v19 }
  0x1a   : > { %1046 = vpow2.f32 %v423_v11  ;;  %987 = vmatprep.subr.bf16.mxu0 %v1039_v20 }
  0x1b   : > { %1048 = vpow2.f32 %v425_v12 }
  0x1d   : > { %988 = vmatpush3.bf16.msra.mxu0 %v1039_v20 }
  0x1e   : > { %989 = vmatprep.subr.bf16.mxu0 %v1040_v23 }
  0x21   : > { %990 = vmatpush3.bf16.msra.mxu0 %v1040_v23 }
  0x22   : > { %991 = vmatprep.subr.bf16.mxu0 %v1041_v29 }
  0x25   : > { %992 = vmatpush3.bf16.msra.mxu0 %v1041_v29  ;;  %v955_v29 = vld [vmem:[%s372_s14] ss:$0 sm:$0xff] }
  0x26   : > { %993 = vmatprep.subr.bf16.mxu0 %v1042_v39 }
  0x27   : > { %v1047_v15 = vpop.eup %1046 }
  0x28   : > { %v1049_v16 = vpop.eup %1048  ;;  %v427_v17 = vadd.f32 1.0, %v1047_v15  ;;  %v430_v21 = vmul.f32 -0.5, %v1047_v15  ;;  %v433_v25 = vand.u32 2147483647, %v1047_v15 }
  0x29   : > { %v436_v18 = vadd.f32 1.0, %v1049_v16  ;;  %v439_v22 = vmul.f32 -0.5, %v1049_v16  ;;  %v442_v27 = vand.u32 2147483647, %v1049_v16  ;;  %994 = vmatpush3.bf16.msra.mxu0 %v1042_v39 }
  0x2a   : > { %1050 = vlog2.f32 %v427_v17  ;;  %v431_v24 = vadd.f32 1.0, %v430_v21  ;;  %vm434_vm1 = vcmp.lt.f32.partialorder %v433_v25, 0.0004427343  ;;  %995 = vmatprep.subr.bf16.mxu0 %v1043_v45 }
  0x2b   : > { %1052 = vlog2.f32 %v436_v18  ;;  %v440_v26 = vadd.f32 1.0, %v439_v22  ;;  %vm443_vm2 = vcmp.lt.f32.partialorder %v442_v27, 0.0004427343 }
  0x2c   : > { %v432_v30 = vmul.f32 %v1047_v15, %v431_v24 }
  0x2d   : > { %v441_v33 = vmul.f32 %v1049_v16, %v440_v26  ;;  %996 = vmatpush3.bf16.msra.mxu0 %v1043_v45 }
  0x37   : > { %v1051_v31 = vpop.eup %1050 }
  0x38   : > { %v1053_v34 = vpop.eup %1052  ;;  %v429_v35 = vmul.f32 0.6931472, %v1051_v31 }
  0x39   : > { %v438_v38 = vmul.f32 0.6931472, %v1053_v34 }
  0x3a   : > { %v435_v40 = vsel %vm434_vm1, %v432_v30, %v429_v35 }
  0x3b   : > { %v445_v41 = vadd.f32 %v435_v40, %v417_v32  ;;  %v444_v42 = vsel %vm443_vm2, %v441_v33, %v438_v38 }
  0x3c   : > { %v446_v43 = vadd.f32 %v444_v42, %v418_v36 }
  0x3d   : > { %v447_v44 = vsub.f32 %v1172_v5, %v445_v41  ;;  %v461_v55 = vsel %vm458_vm3, %v445_v41, 0.0  ;;  %v1094_v5 = vmov 0.0  }
  0x3e   : > { %v448_v46 = vsub.f32 %v1174_v6, %v446_v43  ;;  %v462_v47 = vsel %vm458_vm3, %v446_v43, 0.0  ;;  %396 = vst.msk [vmem:[#allocation4 + $0x8] sm:$0xff] %vm392_vm5, %v1094_v5  ;;  %393 = vst.msk [vmem:[#allocation3] sm:$0xff] %vm392_vm5, %v1094_v5  ;;  %v1095_v6 = vmov 0  }
  0x3f   : > { %v449_v48 = vmul.f32 1.442695, %v447_v44  ;;  %394 = vst.msk [vmem:[#allocation3 + $0x8] sm:$0xff] %vm392_vm5, %v1094_v5  ;;  %395 = vst.msk [vmem:[#allocation4] sm:$0xff] %vm392_vm5, %v1094_v5  ;;  %1035 = vset.pattern.permute.xlu1 %v1095_v6  ;;  %1034 = vset.pattern.permute.xlu0 %v1095_v6 }
  0x40   : > { %v451_v49 = vmul.f32 1.442695, %v448_v46 }
  0x41   : > { %1054 = vpow2.f32 %v449_v48 }
  0x42   : > { %1056 = vpow2.f32 %v451_v49 }
  0x45   : > { %v465_v10 = vld [vmem:[#allocation3] sm:$0xff]  ;;  %v477_v16 = vld [vmem:[#allocation4 + $0x8] sm:$0xff] }
  0x46   : > { %v476_v7 = vld [vmem:[#allocation4] sm:$0xff]  ;;  %v466_v19 = vld [vmem:[#allocation3 + $0x8] sm:$0xff] }
  0x4e   : > { %v1055_v50 = vpop.eup %1054 }
  0x4f   : > { %v1057_v51 = vpop.eup %1056  ;;  %v463_v52 = vsel %vm458_vm3, %v1055_v50, 0.0 }
  0x50   : > { %478 = vadd.xlane.f32.xlu0 %v463_v52  ;;  %v464_v53 = vsel %vm458_vm3, %v1057_v51, 0.0  ;;  %v951_v54 = vpack.c.bf16 %v1057_v51, %v1055_v50 }
  0x52   : > { %998 = vmatmul.mubr.msk.bf16.vlgmr.msra.gmra.mxu0 %vm950_vm4, %v951_v54 }
  0x54   : > { %467 = vadd.xlane.f32.xlu0 %v461_v55 }
  0x9a   : > { %v610_v56 = vpop.xlane.xlu0 %609 }
  0x9b   : > { %v614_v57 = vsub.f32 %v1153_v0, %v610_v56  ;;  %v964_v0 = vld [vmem:[%s348_s11] sm:$0xff]  }
  0x9c   : > { %v965_v4 = vunpack.c.l.bf16 %v964_v0 }
  0x9d   : > { %v616_v58 = vmul.f32 1.442695, %v614_v57 }
  0x9e   : > { %v613_v59 = vpop.xlane.xlu0 %612 }
  0x9f   : > { %1058 = vpow2.f32 %v616_v58  ;;  %v615_v60 = vsub.f32 %v1155_v1, %v613_v59  ;;  %v966_v1 = vunpack.c.h.bf16 %v964_v0 }
  0xa1   : > { %v618_v61 = vmul.f32 1.442695, %v615_v60  ;;  %1001 = vmatprep.subr.mxu1 %v966_v1 }
  0xa2   : > { %1002 = vmatpush3.msra.mxu1 %v966_v1 }
  0xa3   : > { %1060 = vpow2.f32 %v618_v61  ;;  %1003 = vmatprep.subr.mxu1 %v965_v4 }
  0xa4   : > { %1004 = vmatpush3.msra.mxu1 %v965_v4 }
  0xac   : > { %v1059_v62 = vpop.eup %1058 }
  0xad   : > { %v620_v63 = vsel %vm607_vm0, %v1059_v62, 0.0 }
  0xae   : > { %621 = vadd.xlane.f32.xlu1 %v620_v63 }
  0xb0   : > { %v1061_v2 = vpop.eup %1060 }
  0xb1   : > { %v623_v3 = vsel %vm607_vm0, %v1061_v2, 0.0 }
  0xb2   : > { %624 = vadd.xlane.f32.xlu1 %v623_v3 }
  0xb6   : > { %480 = vadd.xlane.f32.xlu1 %v464_v53 }
  0xba   : > { %469 = vadd.xlane.f32.xlu1 %v462_v47 }
  0xd9   : > { %v479_v8 = vpop.xlane.xlu0 %478 }
  0xda   : > { %v482_v9 = vadd.f32 %v479_v8, %v476_v7 }
  0xdc   : > { %484 = vst.msk [vmem:[#allocation4] sm:$0xff] %vm392_vm5, %v482_v9 }
  0xdd   : > { %v468_v11 = vpop.xlane.xlu0 %467 }
  0xde   : > { %v471_v12 = vadd.f32 %v468_v11, %v465_v10 }
  0xe0   : > { %474 = vst.msk [vmem:[#allocation3] sm:$0xff] %vm392_vm5, %v471_v12 }
  0xe3   : > { %v737_v13 = vld [vmem:[#allocation4] sm:$0xff] }
  0xe4   : > { %742 = vperm.xlu0 %1034, %v737_v13  }
  0xe7   : > { %v721_v27 = vld [vmem:[#allocation3] sm:$0xff] }
 0x112   : > { %v999_v36 = vpop.f32.mrf.mxu0 }
 0x113   : > { %v760_v41 = vmul.f32 2.0, %v999_v36 }
 0x114   : > { %v579_v37 = vpop.f32.mrf.mxu0 }
 0x115   : > { %v762_v46 = vadd.f32 1.0, %v760_v41 }
 0x116   : > { %v1000_v39 = vpop.f32.mrf.mxu0 }
 0x117   : > { %v761_v40 = vmul.f32 2.0, %v1000_v39 }
 0x118   : > { %v582_v42 = vpop.f32.mrf.mxu0 }
 0x119   : > { %v763_v44 = vadd.f32 1.0, %v761_v40 }
 0x137   : > { %v622_v14 = vpop.xlane.xlu1 %621 }
 0x138   : > { %1062 = vrcp.f32 %v622_v14 }
 0x13b   : > { %v625_v15 = vpop.xlane.xlu1 %624 }
 0x13c   : > { %1064 = vrcp.f32 %v625_v15 }
 0x13f   : > { %v481_v17 = vpop.xlane.xlu1 %480 }
 0x140   : > { %v483_v18 = vadd.f32 %v481_v17, %v477_v16 }
 0x142   : > { %485 = vst.msk [vmem:[#allocation4 + $0x8] sm:$0xff] %vm392_vm5, %v483_v18 }
 0x143   : > { %v470_v20 = vpop.xlane.xlu1 %469 }
 0x144   : > { %v472_v21 = vadd.f32 %v470_v20, %v466_v19 }
 0x145   : > { %v1063_v22 = vpop.eup %1062 }
 0x146   : > { %v627_v23 = vmul.f32 %v1063_v22, %v1059_v62  ;;  %475 = vst.msk [vmem:[#allocation3 + $0x8] sm:$0xff] %vm392_vm5, %v472_v21 }
 0x148   : > { %1005 = vmatprep.mubr.msk.f32.mxu1 %vm607_vm0, %v627_v23 }
 0x149   : > { %v1065_v24 = vpop.eup %1064  ;;  %v738_v25 = vld [vmem:[#allocation4 + $0x8] sm:$0xff] }
 0x14a   : > { %v629_v26 = vmul.f32 %v1065_v24, %v1061_v2  ;;  %747 = vperm.xlu1 %1035, %v738_v25  }
 0x14c   : > { %1006 = vmatmul.mubr.msk.f32.vlgmr.msra.gmra.mxu1 %vm607_vm0, %v629_v26 }
 0x14d   : > { %v722_v28 = vld [vmem:[#allocation3 + $0x8] sm:$0xff] }
 0x14e   : > { %725 = vperm.xlu1 %1035, %v721_v27  }
 0x152   : > { %730 = vperm.xlu1 %1035, %v722_v28  }
 0x15f   : > { %v743_v31 = vpop.permute.xlu0 %742 }
 0x160   : > { %v756_v33 = vadd.f32 %v955_v29, %v743_v31 }
 0x162   : > { %v758_v35 = vadd.f32 1.0, %v756_v33 }
 0x1c5   : > { %v748_v30 = vpop.permute.xlu1 %747 }
 0x1c6   : > { %v757_v32 = vadd.f32 %v955_v29, %v748_v30 }
 0x1c8   : > { %v759_v34 = vadd.f32 1.0, %v757_v32 }
 0x1c9   : > { %v726_v38 = vpop.permute.xlu1 %725 }
 0x1ca   : > { %1066 = vrcp.f32 %v759_v34  ;;  %v733_v49 = vsub.f32 %v726_v38, %v579_v37 }
 0x1cb   : > { %1068 = vrcp.f32 %v758_v35 }
 0x1cc   : > { %v735_v56 = vmul.f32 0.03125, %v733_v49 }
 0x1cd   : > { %v731_v43 = vpop.permute.xlu1 %730 }
 0x1ce   : > { %v734_v47 = vsub.f32 %v731_v43, %v582_v42 }
 0x1d0   : > { %v736_v52 = vmul.f32 0.03125, %v734_v47 }
 0x1d7   : > { %v1067_v45 = vpop.eup %1066 }
 0x1d8   : > { %v1069_v48 = vpop.eup %1068  ;;  %v767_v50 = vmul.f32 %v1067_v45, %v763_v44 }
 0x1d9   : > { %v766_v54 = vmul.f32 %v1069_v48, %v762_v46 }
 0x1da   : > { %v769_v57 = vsub.f32 1.0, %v767_v50 }
 0x1db   : > { %v768_v61 = vsub.f32 1.0, %v766_v54 }
 0x20c   : > { %v1007_v51 = vpop.f32.mrf.mxu1 }
 0x20d   : > { %v716_v53 = vsub.f32 0.0, %v1007_v51 }
 0x20e   : > { %v706_v55 = vpop.f32.mrf.mxu1 }
 0x20f   : > { %v771_v58 = vadd.f32 %v736_v52, %v716_v53  ;;  %v715_v59 = vsub.f32 0.0, %v706_v55 }
 0x211   : > { %v773_v60 = vadd.f32 %v771_v58, %v769_v57  ;;  %v770_v62 = vadd.f32 %v735_v56, %v715_v59 }
 0x213   : > { %775 = vst [vmem:[%s381_s17 + $0x8] sm:$0xff] %v773_v60  ;;  %v772_v63 = vadd.f32 %v770_v62, %v768_v61 }
 0x215   : > { %774 = vst [vmem:[%s381_s17] sm:$0xff] %v772_v63 }
 0x216 PF: > { %s15_s20 = sadd.s32 1, %s1092_s20   ;;  %s1239_s18 = smov %s1088_s19 }
 0x217   : > { %p12_p5 = scmp.ge.s32.totalorder %s15_s20, 4   ;;  %s1240_s19 = smov %s1242_s21 }
 0x219   :  { %14 = sbr.rel (!%p12_p5) target bundleno = 2 (0x2), region = 90 }

</bundles_post_ra>
